<compile_context>
chip_gen: v7x
topology: tpu7x:2x2x1
jax: 0.10.0
libtpu: 0.0.40
codegen_flags: <defaults>
</compile_context>

<pallas_src>
import functools
import math

import jax
import jax.numpy as jnp
from jax.experimental import pallas as pl
from jax.experimental.pallas import tpu as pltpu


_VMEM_LIMIT = 32 * 1024 * 1024


# ------------------------------ tiling helpers --------------------------------

def _round_up(n, m):
    return ((n + m - 1) // m) * m


def _pick_tile(n, pref, align):
    """Largest multiple of `align` dividing n and <= pref, else n (full)."""
    if n <= pref:
        return n
    t = (pref // align) * align
    while t >= align:
        if n % t == 0:
            return t
        t -= align
    return n


def _tile_and_pad(n, pref, align):
    """Pick a tile (multiple of `align`, <= pref) and the padded extent it divides."""
    tile = min(pref, _round_up(n, align))
    return tile, _round_up(n, tile)


def _heads_per_block(heads, head_dim):
    """Heads processed per attention grid step so the block is ~128 lanes wide."""
    cap = max(1, 128 // head_dim)
    hb = 1
    for c in range(1, heads + 1):
        if heads % c == 0 and c <= cap:
            hb = c
    if (hb * head_dim) % 128 != 0 and hb != heads:
        hb = heads  # fall back to a full-width (lane-dense "full dim") block
    return hb


# ------------------------- rotate_half implementation ------------------------

_ROLL_MODE_CACHE = {}


def _probe_roll_mode(width):
    """Detect pltpu.roll lane direction once per width (None -> matmul fallback)."""
    if width in _ROLL_MODE_CACHE:
        return _ROLL_MODE_CACHE[width]
    mode = None
    if width >= 4 and width % 2 == 0:
        def probe_kernel(o_ref):
            x = jax.lax.broadcasted_iota(jnp.int32, (8, width), 1)
            o_ref[...] = pltpu.roll(x, 1, axis=1)
        try:
            y = jax.device_get(pl.pallas_call(
                probe_kernel,
                out_shape=jax.ShapeDtypeStruct((8, width), jnp.int32))())
            if int(y[0, 1]) == 0 and int(y[0, 2]) == 1:
                mode = "up"      # roll(x,1)[j] == x[j-1]
            elif int(y[0, 1]) == 2 and int(y[0, 2]) == 3:
                mode = "down"    # roll(x,1)[j] == x[j+1]
        except Exception:
            mode = None
    _ROLL_MODE_CACHE[width] = mode
    return mode


def _make_rotate_half(width):
    """rotate_half over interleaved pairs: (x0,x1,x2,x3,..) -> (-x1,x0,-x3,x2,..).

    Returns (rotate_half(x, parity), make_parity(shape)).  The parity mask is
    built once per kernel body (JAX does not CSE broadcast_in_dim).
    Pairs are local (stride 2), so this is valid on the concatenated (H*d)
    lane layout as well — it never mixes heads.
    """
    mode = _probe_roll_mode(width)
    if mode is not None:
        shift_up = 1 if mode == "up" else width - 1     # up[:, j] = x[:, j-1]
        shift_down = width - 1 if mode == "up" else 1   # dn[:, j] = x[:, j+1]

        def make_parity(shape):
            lane = jax.lax.broadcasted_iota(jnp.int32, shape, len(shape) - 1)
            return (lane % 2) == 0

        def rotate_half(x, even_mask):
            up = pltpu.roll(x, shift_up, axis=x.ndim - 1)
            dn = pltpu.roll(x, shift_down, axis=x.ndim - 1)
            # even lanes take -x[j+1], odd lanes take x[j-1]; wrap lanes unused.
            return jnp.where(even_mask, -dn, up)
        return rotate_half, make_parity

    # Fallback: rotate_half as x @ R, R constant-folded block-pairwise rotation.
    def make_parity(shape):
        return None

    def rotate_half(x, even_mask):
        r = jax.lax.broadcasted_iota(jnp.int32, (width, width), 0)
        c = jax.lax.broadcasted_iota(jnp.int32, (width, width), 1)
        rot = jnp.where((c % 2 == 0) & (r == c + 1), -1.0,
                        jnp.where((c % 2 == 1) & (r == c - 1), 1.0, 0.0))
        return jnp.dot(x, rot.astype(x.dtype),
                       preferred_element_type=jnp.float32).astype(x.dtype)
    return rotate_half, make_parity


# ---------------- fused LayerNorm + projection + RoPE (lane-dense) -----------

def _ln_proj_rope_kernel(x_ref, g_ref, b_ref, pos_ref, *rest, eps, rotate_flags,
                         rotate_half, make_parity, compute_dtype):
    n_out = len(rotate_flags)
    w_refs = rest[:n_out]
    o_refs = rest[n_out:]

    # LayerNorm once per m-tile (f32), then one wide matmul per output.
    x = x_ref[...]
    mean = jnp.mean(x, axis=-1, keepdims=True)
    var = jnp.mean(jnp.square(x - mean), axis=-1, keepdims=True)
    xn = (x - mean) * jax.lax.rsqrt(var + eps)
    xn = (xn * g_ref[...] + b_ref[...]).astype(compute_dtype)

    cos = sin = even = None
    if any(rotate_flags):
        pos = pos_ref[...]                                  # (tm, H*d) f32
        cos, sin = jnp.cos(pos), jnp.sin(pos)
        even = make_parity(pos.shape)

    for w_ref, o_ref, rot in zip(w_refs, o_refs, rotate_flags):
        y = jnp.dot(xn, w_ref[...], preferred_element_type=jnp.float32)
        if rot:
            y = y * cos + rotate_half(y, even) * sin
        o_ref[...] = y.astype(o_ref.dtype)


def _ln_proj_rope(x2, gamma, beta, pos_tiled, weights, rotate_flags, *,
                  rotate_half, make_parity, tm_pref=512, eps=1e-5,
                  compute_dtype=jnp.bfloat16, out_dtype=jnp.bfloat16):
    m, din = x2.shape
    hd = pos_tiled.shape[1]
    douts = [int(w.shape[1]) for w in weights]
    tm = _pick_tile(m, tm_pref, 16)
    kernel = functools.partial(
        _ln_proj_rope_kernel, eps=eps, rotate_flags=tuple(rotate_flags),
        rotate_half=rotate_half, make_parity=make_parity,
        compute_dtype=compute_dtype)
    in_specs = ([pl.BlockSpec((tm, din), lambda i: (i, 0)),
                 pl.BlockSpec((1, din), lambda i: (0, 0)),
                 pl.BlockSpec((1, din), lambda i: (0, 0)),
                 pl.BlockSpec((tm, hd), lambda i: (i, 0))]
                + [pl.BlockSpec((din, do), lambda i: (0, 0)) for do in douts])
    out_specs = [pl.BlockSpec((tm, do), lambda i: (i, 0)) for do in douts]
    out_shape = [jax.ShapeDtypeStruct((m, do), out_dtype) for do in douts]
    outs = pl.pallas_call(
        kernel, grid=(m // tm,), in_specs=in_specs, out_specs=out_specs,
        out_shape=out_shape,
        compiler_params=pltpu.CompilerParams(
            dimension_semantics=("parallel",), vmem_limit_bytes=_VMEM_LIMIT),
    )(x2, gamma.reshape(1, din), beta.reshape(1, din), pos_tiled, *weights)
    return list(outs) if isinstance(outs, (list, tuple)) else [outs]


# ------------------------ flash attention (pre-rotated) ----------------------

def _flash_attn_kernel(*refs, heads_blk, head_dim, has_mask):
    if has_mask:
        q_ref, k_ref, v_ref, bias_ref = refs[:4]
        o_ref, m_sc, l_sc, acc_sc = refs[4:]
    else:
        q_ref, k_ref, v_ref = refs[:3]
        bias_ref = None
        o_ref, m_sc, l_sc, acc_sc = refs[3:]

    ki = pl.program_id(3)

    @pl.when(ki == 0)
    def _init():
        m_sc[...] = jnp.full(m_sc.shape, -jnp.inf, m_sc.dtype)
        l_sc[...] = jnp.zeros(l_sc.shape, l_sc.dtype)
        acc_sc[...] = jnp.zeros(acc_sc.shape, acc_sc.dtype)

    q = q_ref[0]                                 # (tq, HB*d) bf16, rotated+scaled
    k = k_ref[0]                                 # (tk, HB*d) bf16, rotated
    v = v_ref[0]                                 # (tk, HB*d) bf16
    bias = bias_ref[0] if has_mask else None     # (1, tk) f32 additive

    for h in range(heads_blk):
        sl = slice(h * head_dim, (h + 1) * head_dim)
        s = jax.lax.dot_general(
            q[:, sl], k[:, sl],
            dimension_numbers=(((1,), (1,)), ((), ())),
            preferred_element_type=jnp.float32)                  # (tq, tk)
        if has_mask:
            s = s + bias
        m_prev = m_sc[:, h:h + 1]
        m_new = jnp.maximum(m_prev, jnp.max(s, axis=-1, keepdims=True))
        alpha = jnp.exp(m_prev - m_new)
        p = jnp.exp(s - m_new)
        l_sc[:, h:h + 1] = alpha * l_sc[:, h:h + 1] + jnp.sum(p, axis=-1,
                                                              keepdims=True)
        acc_sc[:, sl] = alpha * acc_sc[:, sl] + jnp.dot(
            p.astype(v.dtype), v[:, sl], preferred_element_type=jnp.float32)
        m_sc[:, h:h + 1] = m_new

    @pl.when(ki == pl.num_programs(3) - 1)
    def _finalize():
        inv = pl.reciprocal(l_sc[...], approx=True)              # (tq, HB)
        parts = [acc_sc[:, h * head_dim:(h + 1) * head_dim] * inv[:, h:h + 1]
                 for h in range(heads_blk)]
        o = parts[0] if heads_blk == 1 else jnp.concatenate(parts, axis=-1)
        o_ref[0] = o.astype(o_ref.dtype)                         # lane-dense store


def rotary_flash_attention(q, k, v, bias, *, heads, head_dim, tq, tk,
                           out_dtype=jnp.bfloat16):
    """q: (b, nq, H*d); k, v: (b, nk, H*d); all pre-rotated (and q pre-scaled).
    bias: (b, 1, nk) additive f32 or None."""
    b, nq, hd = q.shape
    nk = k.shape[1]
    has_mask = bias is not None
    hb = _heads_per_block(heads, head_dim)
    n_hb = heads // hb
    hbd = hb * head_dim

    kernel = functools.partial(_flash_attn_kernel, heads_blk=hb,
                               head_dim=head_dim, has_mask=has_mask)
    grid = (b, n_hb, nq // tq, nk // tk)

    in_specs = [
        pl.BlockSpec((1, tq, hbd), lambda bi, hi, qi, ki: (bi, qi, hi)),
        pl.BlockSpec((1, tk, hbd), lambda bi, hi, qi, ki: (bi, ki, hi)),
        pl.BlockSpec((1, tk, hbd), lambda bi, hi, qi, ki: (bi, ki, hi)),
    ]
    inputs = [q, k, v]
    if has_mask:
        in_specs.append(
            pl.BlockSpec((1, 1, tk), lambda bi, hi, qi, ki: (bi, 0, ki)))
        inputs.append(bias)

    return pl.pallas_call(
        kernel, grid=grid, in_specs=in_specs,
        out_specs=pl.BlockSpec((1, tq, hbd),
                               lambda bi, hi, qi, ki: (bi, qi, hi)),
        out_shape=jax.ShapeDtypeStruct((b, nq, hd), out_dtype),
        scratch_shapes=[
            pltpu.VMEM((tq, hb), jnp.float32),    # running max per head
            pltpu.VMEM((tq, hb), jnp.float32),    # running denom per head
            pltpu.VMEM((tq, hbd), jnp.float32),   # lane-dense output accumulator
        ],
        compiler_params=pltpu.CompilerParams(
            dimension_semantics=("parallel", "parallel", "parallel", "arbitrary"),
            vmem_limit_bytes=_VMEM_LIMIT),
    )(*inputs)


# --------------- output projection (full-depth contraction, fused rot) -------

def _out_proj_kernel(*refs, rotate_value, rotate_half, make_parity, compute_dtype):
    if rotate_value:
        o_ref, pos_ref, w_ref, b_ref, out_ref = refs
    else:
        o_ref, w_ref, b_ref, out_ref = refs
    o = o_ref[...]
    if rotate_value:
        # apply_rotary_pos_emb(-q_pos, o): cos(-x)=cos(x), sin(-x)=-sin(x)
        of = o.astype(jnp.float32)
        pos = pos_ref[...]
        even = make_parity(of.shape)
        of = of * jnp.cos(pos) - rotate_half(of, even) * jnp.sin(pos)
        o = of.astype(compute_dtype)
    else:
        o = o.astype(compute_dtype)
    y = jnp.dot(o, w_ref[...], preferred_element_type=jnp.float32)
    out_ref[...] = (y + b_ref[...]).astype(out_ref.dtype)


def _out_proj(o2, pos_tiled, w, bias, *, rotate_value, rotate_half, make_parity,
              tm_pref=512, compute_dtype=jnp.bfloat16, out_dtype=jnp.float32):
    m, hd = o2.shape
    dim = int(w.shape[1])
    tm = _pick_tile(m, tm_pref, 16)
    kernel = functools.partial(_out_proj_kernel, rotate_value=rotate_value,
                               rotate_half=rotate_half, make_parity=make_parity,
                               compute_dtype=compute_dtype)
    in_specs = [pl.BlockSpec((tm, hd), lambda i: (i, 0))]
    inputs = [o2]
    if rotate_value:
        in_specs.append(pl.BlockSpec((tm, hd), lambda i: (i, 0)))
        inputs.append(pos_tiled)
    in_specs += [pl.BlockSpec((hd, dim), lambda i: (0, 0)),
                 pl.BlockSpec((1, dim), lambda i: (0, 0))]
    inputs += [w, bias.reshape(1, dim)]
    return pl.pallas_call(
        kernel, grid=(m // tm,), in_specs=in_specs,
        out_specs=pl.BlockSpec((tm, dim), lambda i: (i, 0)),
        out_shape=jax.ShapeDtypeStruct((m, dim), out_dtype),
        compiler_params=pltpu.CompilerParams(
            dimension_semantics=("parallel",), vmem_limit_bytes=_VMEM_LIMIT),
    )(*inputs)


# --------------------------- module-level wrapper -----------------------------

def init_params(key, dim, context_dim, heads, dim_head):
    inner = heads * dim_head
    ks = jax.random.split(key, 4)
    return {
        'norm_g': jnp.ones((dim,), jnp.float32),
        'norm_b': jnp.zeros((dim,), jnp.float32),
        'normc_g': jnp.ones((context_dim,), jnp.float32),
        'normc_b': jnp.zeros((context_dim,), jnp.float32),
        'w_q': 0.02 * jax.random.normal(ks[0], (dim, inner), jnp.float32),
        'w_kv': 0.02 * jax.random.normal(ks[1], (context_dim, 2 * inner), jnp.float32),
        'w_out': 0.02 * jax.random.normal(ks[2], (inner, dim), jnp.float32),
        'b_out': 0.01 * jax.random.normal(ks[3], (dim,), jnp.float32),
    }


def rotary_cross_attention_forward(params, x_query, x_context, query_pos_emb,
                                   context_pos_emb, context_mask=None, *,
                                   heads, rotate_value,
                                   matmul_dtype=jnp.bfloat16,
                                   tq_pref=256, tk_pref=512):
    b, nq, dim = x_query.shape
    _, nk, cdim = x_context.shape
    inner = params['w_q'].shape[1]
    d = inner // heads
    scale = 1.0 / math.sqrt(d)

    rotate_half, make_parity = _make_rotate_half(inner)

    # Host-side tile choice + padding (16-aligned for bf16 sublane packing).
    tq, nq_p = _tile_and_pad(nq, tq_pref, 16)
    tk_align = 128 if nk >= 128 else 16
    tk, nk_p = _tile_and_pad(nk, tk_pref, tk_align)
    if nq_p > nq:
        x_query = jnp.pad(x_query, ((0, 0), (0, nq_p - nq), (0, 0)))
        query_pos_emb = jnp.pad(query_pos_emb, ((0, 0), (0, nq_p - nq), (0, 0)))
    if nk_p > nk:
        x_context = jnp.pad(x_context, ((0, 0), (0, nk_p - nk), (0, 0)))
        context_pos_emb = jnp.pad(context_pos_emb, ((0, 0), (0, nk_p - nk), (0, 0)))

    # One-time host weight prep: 1/sqrt(d) folded into w_q; bf16 pre-cast.
    wq = (params['w_q'] * scale).astype(matmul_dtype)
    wk = params['w_kv'][:, :inner].astype(matmul_dtype)
    wv = params['w_kv'][:, inner:].astype(matmul_dtype)
    wo = params['w_out'].astype(matmul_dtype)

    # Pos embeddings tiled head-wise to (rows, H*d) so RoPE applies per head slice.
    qpos_t = jnp.tile(query_pos_emb.reshape(b * nq_p, d), (1, heads))
    kpos_t = jnp.tile(context_pos_emb.reshape(b * nk_p, d), (1, heads))

    # Fused LayerNorm + projection + RoPE (Q pre-scaled+rotated; K (and V when
    # rotate_value) pre-rotated -> nothing trigonometric in the attention loop).
    (q2,) = _ln_proj_rope(
        x_query.reshape(b * nq_p, dim), params['norm_g'], params['norm_b'],
        qpos_t, [wq], [True], rotate_half=rotate_half, make_parity=make_parity,
        compute_dtype=matmul_dtype)
    k2, v2 = _ln_proj_rope(
        x_context.reshape(b * nk_p, cdim), params['normc_g'], params['normc_b'],
        kpos_t, [wk, wv], [True, rotate_value], rotate_half=rotate_half,
        make_parity=make_parity, compute_dtype=matmul_dtype)

    # Additive mask bias in f32 (padded keys always masked out); omitted entirely
    # when there is no mask and no key padding.
    if context_mask is None and nk_p == nk:
        bias = None
    else:
        mask = (context_mask if context_mask is not None
                else jnp.ones((b, nk), bool))
        if nk_p > nk:
            mask = jnp.pad(mask, ((0, 0), (0, nk_p - nk)), constant_values=False)
        bias = jnp.where(mask[:, None, :], 0.0, -1e30).astype(jnp.float32)

    o = rotary_flash_attention(
        q2.reshape(b, nq_p, inner), k2.reshape(b, nk_p, inner),
        v2.reshape(b, nk_p, inner), bias,
        heads=heads, head_dim=d, tq=tq, tk=tk, out_dtype=matmul_dtype)

    # Output projection: single full-depth (H*d) contraction; rotate_value
    # back-rotation with -q_pos is fused here (cos/sin once per token).
    out = _out_proj(o.reshape(b * nq_p, inner), qpos_t, wo, params['b_out'],
                    rotate_value=rotate_value, rotate_half=rotate_half,
                    make_parity=make_parity, compute_dtype=matmul_dtype)
    out = out.reshape(b, nq_p, dim)
    if nq_p > nq:
        out = out[:, :nq]
    return out


# ------------------------------ pure-JAX reference ----------------------------

def _reference_forward(params, xq, xc, qpe, cpe, mask, *, heads, rotate_value):
    def ln(x, g, b):
        m = x.mean(-1, keepdims=True)
        v = ((x - m) ** 2).mean(-1, keepdims=True)
        return (x - m) / jnp.sqrt(v + 1e-5) * g + b

    def rot_half(x):
        x1, x2 = x[..., 0::2], x[..., 1::2]
        return jnp.stack((-x2, x1), axis=-1).reshape(x.shape)

    def apply_rot(pos, t):                       # pos (b,n,d), t (b,h,n,d)
        pos = pos[:, None]
        return t * jnp.cos(pos) + rot_half(t) * jnp.sin(pos)

    xqn = ln(xq, params['norm_g'], params['norm_b'])
    xcn = ln(xc, params['normc_g'], params['normc_b'])
    q = xqn @ params['w_q']
    kv = xcn @ params['w_kv']
    inner = params['w_q'].shape[1]
    k, v = kv[..., :inner], kv[..., inner:]
    b, nq, _ = q.shape
    nk = k.shape[1]
    d = inner // heads

    def split(t, n):
        return t.reshape(b, n, heads, d).transpose(0, 2, 1, 3)

    qh, kh, vh = split(q, nq), split(k, nk), split(v, nk)
    qh, kh = apply_rot(qpe, qh), apply_rot(cpe, kh)
    if rotate_value:
        vh = apply_rot(cpe, vh)
    s = jnp.einsum('bhqd,bhkd->bhqk', qh, kh) / jnp.sqrt(d)
    if mask is not None:
        s = jnp.where(mask[:, None, None, :], s, -1e30)
    p = jax.nn.softmax(s, axis=-1)
    o = jnp.einsum('bhqk,bhkd->bhqd', p, vh)
    if rotate_value:
        o = apply_rot(-qpe, o)
    o = o.transpose(0, 2, 1, 3).reshape(b, nq, inner)
    return o @ params['w_out'] + params['b_out']


# ------------------------------------ main ------------------------------------

if __name__ == "__main__":
    B, NQ, NK = 2, 8, 16
    DIM, CTX_DIM = 32, 32
    HEADS, DIM_HEAD = 2, 8

    key = jax.random.PRNGKey(0)
    k1, k2, k3, k4, k5, kp = jax.random.split(key, 6)
    x_query = jax.random.normal(k1, (B, NQ, DIM), jnp.float32)
    x_context = jax.random.normal(k2, (B, NK, CTX_DIM), jnp.float32)
    query_pos_emb = jax.random.normal(k3, (B, NQ, DIM_HEAD), jnp.float32)
    context_pos_emb = jax.random.normal(k4, (B, NK, DIM_HEAD), jnp.float32)
    context_mask = jax.random.uniform(k5, (B, NK)) > 0.2     # True = attend
    context_mask = context_mask.at[:, 0].set(True)           # keep >=1 key per row

    params = init_params(kp, DIM, CTX_DIM, HEADS, DIM_HEAD)

    # config 1: masked, rotate_value=True
    out = rotary_cross_attention_forward(
        params, x_query, x_context, query_pos_emb, context_pos_emb,
        context_mask, heads=HEADS, rotate_value=True)
    out = jax.block_until_ready(out)
    ref = _reference_forward(
        params, x_query, x_context, query_pos_emb, context_pos_emb,
        context_mask, heads=HEADS, rotate_value=True)
    assert out.shape == (B, NQ, DIM), out.shape
    assert jnp.allclose(out, ref, atol=1e-2, rtol=1e-2), \
        float(jnp.max(jnp.abs(out - ref)))

    # config 2: no mask, rotate_value=False
    out2 = rotary_cross_attention_forward(
        params, x_query, x_context, query_pos_emb, context_pos_emb,
        None, heads=HEADS, rotate_value=False)
    out2 = jax.block_until_ready(out2)
    ref2 = _reference_forward(
        params, x_query, x_context, query_pos_emb, context_pos_emb,
        None, heads=HEADS, rotate_value=False)
    assert jnp.allclose(out2, ref2, atol=1e-2, rtol=1e-2), \
        float(jnp.max(jnp.abs(out2 - ref2)))

    print("KERNEL_OK")
</pallas_src>

<mosaic_0001>
module attributes {stable_mosaic.version = 11 : i64} {
  func.func @_ln_proj_rope_kernel(%arg0: i32, %arg1: memref<32x32xf32, #tpu.memory_space<vmem>>, %arg2: memref<1x32xf32, #tpu.memory_space<vmem>>, %arg3: memref<1x32xf32, #tpu.memory_space<vmem>>, %arg4: memref<32x16xf32, #tpu.memory_space<vmem>>, %arg5: memref<32x16xbf16, #tpu.memory_space<vmem>>, %arg6: memref<32x16xbf16, #tpu.memory_space<vmem>>) attributes {dimension_semantics = [#tpu.dimension_semantics<parallel>], iteration_bounds = array<i64: 1>, scalar_prefetch = 0 : i64, scratch_operands = 0 : i64, tpu.core_type = #tpu.core_type<tc>, window_params = [{transform_indices = @transform_0, window_bounds = array<i64: 32, 32>}, {pipeline_mode = #tpu.pipeline_mode<synchronous>, transform_indices = @transform_1, window_bounds = array<i64: 1, 32>}, {pipeline_mode = #tpu.pipeline_mode<synchronous>, transform_indices = @transform_2, window_bounds = array<i64: 1, 32>}, {transform_indices = @transform_3, window_bounds = array<i64: 32, 16>}, {pipeline_mode = #tpu.pipeline_mode<synchronous>, transform_indices = @transform_4, window_bounds = array<i64: 32, 16>}, {transform_indices = @transform_5, window_bounds = array<i64: 32, 16>}]} {
    %c0 = arith.constant 0 : index
    %c0_0 = arith.constant 0 : index
    %0 = vector.load %arg1[%c0, %c0_0] : memref<32x32xf32, #tpu.memory_space<vmem>>, vector<32x32xf32>
    %cst = arith.constant dense<0.000000e+00> : vector<32xf32>
    %1 = vector.multi_reduction <add>, %0, %cst [1] : vector<32x32xf32> to vector<32xf32>
    %2 = vector.shape_cast %1 : vector<32xf32> to vector<32x1xf32>
    %cst_1 = arith.constant 3.200000e+01 : f32
    %3 = vector.broadcast %cst_1 : f32 to vector<32x1xf32>
    %4 = arith.divf %2, %3 : vector<32x1xf32>
    %5 = vector.broadcast %4 : vector<32x1xf32> to vector<32x32xf32>
    %6 = arith.subf %0, %5 : vector<32x32xf32>
    %7 = arith.mulf %6, %6 : vector<32x32xf32>
    %cst_2 = arith.constant dense<0.000000e+00> : vector<32xf32>
    %8 = vector.multi_reduction <add>, %7, %cst_2 [1] : vector<32x32xf32> to vector<32xf32>
    %9 = vector.shape_cast %8 : vector<32xf32> to vector<32x1xf32>
    %cst_3 = arith.constant 3.200000e+01 : f32
    %10 = vector.broadcast %cst_3 : f32 to vector<32x1xf32>
    %11 = arith.divf %9, %10 : vector<32x1xf32>
    %12 = vector.broadcast %4 : vector<32x1xf32> to vector<32x32xf32>
    %13 = arith.subf %0, %12 : vector<32x32xf32>
    %cst_4 = arith.constant 9.99999974E-6 : f32
    %14 = vector.broadcast %cst_4 : f32 to vector<32x1xf32>
    %15 = arith.addf %11, %14 : vector<32x1xf32>
    %16 = math.rsqrt %15 : vector<32x1xf32>
    %17 = vector.broadcast %16 : vector<32x1xf32> to vector<32x32xf32>
    %18 = arith.mulf %13, %17 : vector<32x32xf32>
    %c0_5 = arith.constant 0 : index
    %c0_6 = arith.constant 0 : index
    %19 = vector.load %arg2[%c0_5, %c0_6] : memref<1x32xf32, #tpu.memory_space<vmem>>, vector<1x32xf32>
    %20 = vector.broadcast %19 : vector<1x32xf32> to vector<32x32xf32>
    %21 = arith.mulf %18, %20 : vector<32x32xf32>
    %c0_7 = arith.constant 0 : index
    %c0_8 = arith.constant 0 : index
    %22 = vector.load %arg3[%c0_7, %c0_8] : memref<1x32xf32, #tpu.memory_space<vmem>>, vector<1x32xf32>
    %23 = vector.broadcast %22 : vector<1x32xf32> to vector<32x32xf32>
    %24 = arith.addf %21, %23 : vector<32x32xf32>
    %25 = arith.truncf %24 : vector<32x32xf32> to vector<32x32xbf16>
    %c0_9 = arith.constant 0 : index
    %c0_10 = arith.constant 0 : index
    %26 = vector.load %arg4[%c0_9, %c0_10] : memref<32x16xf32, #tpu.memory_space<vmem>>, vector<32x16xf32>
    %27 = math.cos %26 : vector<32x16xf32>
    %28 = math.sin %26 : vector<32x16xf32>
    %c0_11 = arith.constant 0 : index
    %c0_12 = arith.constant 0 : index
    %29 = vector.load %arg5[%c0_11, %c0_12] : memref<32x16xbf16, #tpu.memory_space<vmem>>, vector<32x16xbf16>
    %cst_13 = arith.constant dense<0.000000e+00> : vector<32x16xf32>
    %30 = tpu.matmul %25, %29, %cst_13 {dimension_numbers = #tpu.dot_dimension_numbers<[1], [0], [0], [1], [0, 0, 1, 1], [], []>} : vector<32x32xbf16>, vector<32x16xbf16>, vector<32x16xf32> -> vector<32x16xf32>
    %31 = arith.mulf %30, %27 : vector<32x16xf32>
    %32 = tpu.iota {dimensions = array<i32: 0>} : vector<16x16xi32>
    %33 = tpu.iota {dimensions = array<i32: 1>} : vector<16x16xi32>
    %c2_i32 = arith.constant 2 : i32
    %c0_i32 = arith.constant 0 : i32
    %34 = arith.cmpi eq, %c2_i32, %c0_i32 : i32
    %c1_i32 = arith.constant 1 : i32
    %35 = arith.select %34, %c1_i32, %c2_i32 : i32
    %36 = vector.broadcast %35 : i32 to vector<16x16xi32>
    %37 = arith.remsi %33, %36 : vector<16x16xi32>
    %c0_i32_14 = arith.constant 0 : i32
    %38 = vector.broadcast %c0_i32_14 : i32 to vector<16x16xi32>
    %39 = arith.cmpi ne, %37, %38 : vector<16x16xi32>
    %c0_i32_15 = arith.constant 0 : i32
    %40 = vector.broadcast %c0_i32_15 : i32 to vector<16x16xi32>
    %41 = arith.cmpi slt, %37, %40 : vector<16x16xi32>
    %c0_i32_16 = arith.constant 0 : i32
    %42 = arith.cmpi slt, %35, %c0_i32_16 : i32
    %43 = vector.broadcast %42 : i1 to vector<16x16xi1>
    %44 = vector.broadcast %43 : vector<16x16xi1> to vector<16x16xi1>
    %45 = arith.xori %41, %44 : vector<16x16xi1>
    %46 = arith.andi %45, %39 : vector<16x16xi1>
    %47 = vector.broadcast %35 : i32 to vector<16x16xi32>
    %48 = arith.addi %37, %47 : vector<16x16xi32>
    %49 = arith.select %46, %48, %37 : vector<16x16xi1>, vector<16x16xi32>
    %c0_i32_17 = arith.constant 0 : i32
    %50 = vector.broadcast %c0_i32_17 : i32 to vector<16x16xi32>
    %51 = arith.cmpi eq, %49, %50 : vector<16x16xi32>
    %c1_i32_18 = arith.constant 1 : i32
    %52 = vector.broadcast %c1_i32_18 : i32 to vector<16x16xi32>
    %53 = arith.addi %33, %52 : vector<16x16xi32>
    %54 = arith.cmpi eq, %32, %53 : vector<16x16xi32>
    %55 = arith.andi %51, %54 : vector<16x16xi1>
    %c2_i32_19 = arith.constant 2 : i32
    %c0_i32_20 = arith.constant 0 : i32
    %56 = arith.cmpi eq, %c2_i32_19, %c0_i32_20 : i32
    %c1_i32_21 = arith.constant 1 : i32
    %57 = arith.select %56, %c1_i32_21, %c2_i32_19 : i32
    %58 = vector.broadcast %57 : i32 to vector<16x16xi32>
    %59 = arith.remsi %33, %58 : vector<16x16xi32>
    %c0_i32_22 = arith.constant 0 : i32
    %60 = vector.broadcast %c0_i32_22 : i32 to vector<16x16xi32>
    %61 = arith.cmpi ne, %59, %60 : vector<16x16xi32>
    %c0_i32_23 = arith.constant 0 : i32
    %62 = vector.broadcast %c0_i32_23 : i32 to vector<16x16xi32>
    %63 = arith.cmpi slt, %59, %62 : vector<16x16xi32>
    %c0_i32_24 = arith.constant 0 : i32
    %64 = arith.cmpi slt, %57, %c0_i32_24 : i32
    %65 = vector.broadcast %64 : i1 to vector<16x16xi1>
    %66 = vector.broadcast %65 : vector<16x16xi1> to vector<16x16xi1>
    %67 = arith.xori %63, %66 : vector<16x16xi1>
    %68 = arith.andi %67, %61 : vector<16x16xi1>
    %69 = vector.broadcast %57 : i32 to vector<16x16xi32>
    %70 = arith.addi %59, %69 : vector<16x16xi32>
    %71 = arith.select %68, %70, %59 : vector<16x16xi1>, vector<16x16xi32>
    %c1_i32_25 = arith.constant 1 : i32
    %72 = vector.broadcast %c1_i32_25 : i32 to vector<16x16xi32>
    %73 = arith.cmpi eq, %71, %72 : vector<16x16xi32>
    %c1_i32_26 = arith.constant 1 : i32
    %74 = vector.broadcast %c1_i32_26 : i32 to vector<16x16xi32>
    %75 = arith.subi %33, %74 : vector<16x16xi32>
    %76 = arith.cmpi eq, %32, %75 : vector<16x16xi32>
    %77 = arith.andi %73, %76 : vector<16x16xi1>
    %cst_27 = arith.constant 1.000000e+00 : f32
    %cst_28 = arith.constant 0.000000e+00 : f32
    %78 = vector.broadcast %cst_27 : f32 to vector<16x16xf32>
    %79 = vector.broadcast %cst_28 : f32 to vector<16x16xf32>
    %80 = arith.select %77, %78, %79 : vector<16x16xi1>, vector<16x16xf32>
    %cst_29 = arith.constant -1.000000e+00 : f32
    %81 = vector.broadcast %cst_29 : f32 to vector<16x16xf32>
    %82 = arith.select %55, %81, %80 : vector<16x16xi1>, vector<16x16xf32>
    %cst_30 = arith.constant dense<0.000000e+00> : vector<32x16xf32>
    %83 = tpu.matmul %30, %82, %cst_30 {dimension_numbers = #tpu.dot_dimension_numbers<[1], [0], [0], [1], [0, 0, 1, 1], [], []>} : vector<32x16xf32>, vector<16x16xf32>, vector<32x16xf32> -> vector<32x16xf32>
    %84 = arith.mulf %83, %28 : vector<32x16xf32>
    %85 = arith.addf %31, %84 : vector<32x16xf32>
    %86 = arith.truncf %85 : vector<32x16xf32> to vector<32x16xbf16>
    %c0_31 = arith.constant 0 : index
    %c0_32 = arith.constant 0 : index
    %87 = vector.load %arg6[%c0_31, %c0_32] : memref<32x16xbf16, #tpu.memory_space<vmem>>, vector<32x16xbf16>
    tpu.vector_store %arg6[%c0_31, %c0_32], %86 {strides = array<i32>} : memref<32x16xbf16, #tpu.memory_space<vmem>>, vector<32x16xbf16>,
    return
  }
  func.func @transform_0(%arg0: i32) -> (i32, i32) {
    %c0_i32 = arith.constant 0 : i32
    %c0_i32_0 = arith.constant 0 : i32
    return %arg0, %c0_i32 : i32, i32
  }
  func.func @transform_1(%arg0: i32) -> (i32, i32) {
    %c0_i32 = arith.constant 0 : i32
    %c0_i32_0 = arith.constant 0 : i32
    %c0_i32_1 = arith.constant 0 : i32
    return %c0_i32, %c0_i32_0 : i32, i32
  }
  func.func @transform_2(%arg0: i32) -> (i32, i32) {
    %c0_i32 = arith.constant 0 : i32
    %c0_i32_0 = arith.constant 0 : i32
    %c0_i32_1 = arith.constant 0 : i32
    return %c0_i32, %c0_i32_0 : i32, i32
  }
  func.func @transform_3(%arg0: i32) -> (i32, i32) {
    %c0_i32 = arith.constant 0 : i32
    %c0_i32_0 = arith.constant 0 : i32
    return %arg0, %c0_i32 : i32, i32
  }
  func.func @transform_4(%arg0: i32) -> (i32, i32) {
    %c0_i32 = arith.constant 0 : i32
    %c0_i32_0 = arith.constant 0 : i32
    %c0_i32_1 = arith.constant 0 : i32
    return %c0_i32, %c0_i32_0 : i32, i32
  }
  func.func @transform_5(%arg0: i32) -> (i32, i32) {
    %c0_i32 = arith.constant 0 : i32
    %c0_i32_0 = arith.constant 0 : i32
    return %arg0, %c0_i32 : i32, i32
  }
}

</mosaic_0001>

<bundles_post_ra>
// kernel: tpu_custom_call.1
= control target key start
LH: loop header
LB: loop body
LE: loop exit
PB: predicated region body
PF: predicated region fallthrough
CT: control target
= control target key end

     0   :  { %vm25_vm0 = vcmask 261120   ;;  %s1843_s0 = inlined_call_operand.vmem [shape: f32[32,32], index: 0, kind: input, shape index: {}]   ;;  %s1844_s4 = inlined_call_operand.vmem [shape: bf16[32,16], index: 4, kind: input, shape index: {}]   ;;  %s1845_s1 = inlined_call_operand.vmem [shape: f32[1,32], index: 1, kind: input, shape index: {}]   ;;  %s1846_s2 = inlined_call_operand.vmem [shape: f32[1,32], index: 2, kind: input, shape index: {}]   ;;  %s1847_s3 = inlined_call_operand.vmem [shape: f32[32,16], index: 3, kind: input, shape index: {}]   ;;  %s1848_s5 = inlined_call_operand.vmem [shape: bf16[32,16], index: 5, kind: output, shape index: {}]  }
   0x1   :  { %v21_v0 = vld [vmem:[%s1843_s0] sm:$0xff]  ;;  %v23_v1 = vld [vmem:[%s1843_s0 + $0x10] sm:$0xff]  ;;  %v22_v2 = vld [vmem:[%s1843_s0 + $0x8] sm:$0xff] }
   0x2   :  { %v26_v3 = vsel %vm25_vm0, %v21_v0, 0.0  ;;  %v32_v4 = vsel %vm25_vm0, %v23_v1, 0.0  ;;  %v24_v5 = vld [vmem:[%s1843_s0 + $0x18] sm:$0xff]  ;;  %v29_v6 = vsel %vm25_vm0, %v22_v2, 0.0  ;;  %v1280_v28 = vld [vmem:[%s1844_s4] sm:$0xff]   ;;  %v1281_v29 = vld [vmem:[%s1844_s4 + $0x8] sm:$0xff]  }
   0x3   :  { %27 = vadd.xlane.f32.xlu0 %v26_v3  ;;  %33 = vadd.xlane.f32.xlu1 %v32_v4  ;;  %v35_v7 = vsel %vm25_vm0, %v24_v5, 0.0  ;;  %v1174_v44 = vld [vmem:[%s1845_s1] ss:$0 sm:$0xff]  ;;  %v1380_v62 = vld [vmem:[%s1847_s3 + $0x10] sm:$0xff] }
   0x4   :  { %1235 = vmatprep.subr.bf16.mxu0 %v1280_v28  ;;  %v1175_v50 = vld [vmem:[%s1846_s2] ss:$0 sm:$0xff]  ;;  %v316_v63 = vand.u32 2139095040, %v1380_v62 }
   0x5   :  { %1236 = vmatpush3.bf16.msra.mxu0 %v1280_v28 }
   0x6   :  { %1237 = vmatprep.subr.bf16.mxu0 %v1281_v29 }
   0x7   :  { %30 = vadd.xlane.f32.xlu0 %v29_v6  ;;  %36 = vadd.xlane.f32.xlu1 %v35_v7 }
   0x9   :  { %1238 = vmatpush3.bf16.msra.mxu0 %v1281_v29 }
  0x90   :  { %v28_v8 = vpop.xlane.xlu0 %27  ;;  %v34_v9 = vpop.xlane.xlu1 %33 }
  0x91   :  { %v39_v10 = vmul.f32 0.03125, %v28_v8  ;;  %v41_v11 = vmul.f32 0.03125, %v34_v9  ;;  %v313_v9 = vand.u32 2147483647, %v1380_v62 }
  0x93   :  { %v43_v12 = vsub.f32 %v21_v0, %v39_v10  ;;  %v45_v13 = vsub.f32 %v23_v1, %v41_v11  ;;  %v317_v0 = vshrl.u32 %v316_v63, 23  ;;  %v1306_v11 = vmov 683565275  }
  0x94   :  { %v31_v14 = vpop.xlane.xlu0 %30  ;;  %v37_v15 = vpop.xlane.xlu1 %36 }
  0x95   :  { %v40_v16 = vmul.f32 0.03125, %v31_v14  ;;  %v42_v17 = vmul.f32 0.03125, %v37_v15  ;;  %v47_v18 = vmul.f32 %v43_v12, %v43_v12  ;;  %v49_v19 = vmul.f32 %v45_v13, %v45_v13 }
  0x96   :  { %v1184_v1 = vadd.s32 4294967169, %v317_v0  ;;  %v1308_v15 = vmov 2131351028  }
  0x97   :  { %v44_v20 = vsub.f32 %v22_v2, %v40_v16  ;;  %v46_v21 = vsub.f32 %v24_v5, %v42_v17  ;;  %v51_v22 = vsel %vm25_vm0, %v47_v18, 0.0  ;;  %v57_v23 = vsel %vm25_vm0, %v49_v19, 0.0 }
  0x98   :  { %52 = vadd.xlane.f32.xlu0 %v51_v22  ;;  %v323_v2 = vadd.s32 1, %v1184_v1  ;;  %v1010_v5 = vlaneseq  ;;  %v1310_v22 = vmov 920167782  }
  0x99   :  { %v48_v24 = vmul.f32 %v44_v20, %v44_v20  ;;  %v50_v25 = vmul.f32 %v46_v21, %v46_v21 }
  0x9a   :  { %vm324_vm1 = vcmp.gt.s32.totalorder %v323_v2, 0  ;;  %v1011_v7 = vshrl.u32 %v1010_v5, 7  ;;  %v1014_v8 = vand.u32 127, %v1010_v5 }
  0x9b   :  { %v54_v26 = vsel %vm25_vm0, %v48_v24, 0.0  ;;  %v60_v27 = vsel %vm25_vm0, %v50_v25, 0.0  ;;  %v325_v3 = vsel %vm324_vm1, %v323_v2, 0 }
  0x9c   :  { %58 = vadd.xlane.f32.xlu0 %v57_v23  ;;  %55 = vadd.xlane.f32.xlu1 %v54_v26  ;;  %v327_v4 = vand.u32 31, %v325_v3  ;;  %v1386_v10 = vshrl.u32 %v325_v3, 5  ;;  %v1012_v17 = vadd.s32 8, %v1011_v7  ;;  %v1019_v18 = vand.u32 1, %v1014_v8 }
  0x9d   :  { %v1212_v19 = vadd.s32 4294967295, %v1014_v8  ;;  %v1028_v25 = vadd.s32 1, %v1014_v8  ;;  %v1311_v26 = vmov 1326507024  }
  0x9e   :  { %v1383_v6 = vsub.s32 32, %v327_v4  ;;  %v336_v16 = vshll.u32 %v1308_v15, %v327_v4  ;;  %v342_v24 = vshll.u32 %v1310_v22, %v327_v4  ;;  %vm1397_vm2 = vcmp.eq.s32.totalorder %v1019_v18, 1 }
  0x9f   :  { %vm1035_vm3 = vcmp.eq.s32.totalorder %v1011_v7, %v1212_v19  ;;  %vm1036_vm4 = vcmp.eq.s32.totalorder %v1012_v17, %v1212_v19  ;;  %vm1027_vm5 = vcmp.eq.s32.totalorder %v1019_v18, 0  ;;  %vm1029_vm6 = vcmp.eq.s32.totalorder %v1011_v7, %v1028_v25 }
  0xa0   :  { %61 = vadd.xlane.f32.xlu1 %v60_v27  ;;  %v340_v23 = vshrl.u32 %v1310_v22, %v1383_v6  ;;  %v343_v27 = vshrl.u32 %v1311_v26, %v1383_v6  ;;  %vm1030_vm7 = vcmp.eq.s32.totalorder %v1012_v17, %v1028_v25  ;;  %vm1037_vm8 = vmand %vm1397_vm2, %vm1035_vm3  ;;  %vm348_vm11 = vcmp.lt.s32.totalorder %v1386_v10, 4 }
  0xa1   :  { %vm1409_vm9 = vmand %vm1027_vm5, %vm1029_vm6  ;;  %vm345_vm13 = vcmp.lt.s32.totalorder %v1386_v10, 1  ;;  %vm347_vm14 = vcmp.lt.s32.totalorder %v1386_v10, 3  ;;  %vm346_vm15 = vcmp.lt.s32.totalorder %v1386_v10, 2  ;;  %vm314_vm3 = vcmp.le.f32.partialorder %v313_v9, 0.7853982 }
  0xa2   :  { %vm1032_vm10 = vmand %vm1027_vm5, %vm1030_vm7  ;;  %vm1849_vm7 = vweird.f32 %v1380_v62 }
  0xa3   :  { %vm1038_vm12 = vmand %vm1397_vm2, %vm1036_vm4  ;;  %vm315_vm2 = vcmp.lt.s32.totalorder %v1380_v62, 0 }
 0x125   :  { %v53_v30 = vpop.xlane.xlu0 %52 }
 0x126   :  { %v63_v31 = vmul.f32 0.03125, %v53_v30  ;;  %v334_v30 = vshrl.u32 %v1308_v15, %v1383_v6 }
 0x128   :  { %v67_v32 = vadd.f32 1e-05, %v63_v31 }
 0x129   :  { %v56_v33 = vpop.xlane.xlu1 %55  ;;  %v59_v34 = vpop.xlane.xlu0 %58 }
 0x12a   :  { %1282 = vrsqrt.f32 %v67_v32  ;;  %v64_v35 = vmul.f32 0.03125, %v56_v33  ;;  %v65_v36 = vmul.f32 0.03125, %v59_v34  ;;  %v1312_v33 = vmov 0.0  }
 0x12b   :  { %v1039_v34 = vsel %vm1037_vm8, 1.0, %v1312_v33  ;;  %vm1043_vm8 = vcmask 130048  }
 0x12c   :  { %v68_v37 = vadd.f32 1e-05, %v64_v35  ;;  %v69_v38 = vadd.f32 1e-05, %v65_v36  ;;  %v320_v36 = vand.u32 8388607, %v313_v9 }
 0x12d   :  { %v62_v39 = vpop.xlane.xlu1 %61 }
 0x12e   :  { %1284 = vrsqrt.f32 %v68_v37  ;;  %v66_v40 = vmul.f32 0.03125, %v62_v39  ;;  %v344_v37 = vor.u32 %v343_v27, %v342_v24  ;;  %v1040_v39 = vsel %vm1038_vm12, 1.0, %v1312_v33 }
 0x12f   :  { %1286 = vrsqrt.f32 %v69_v38  ;;  %v1041_v38 = vsel %vm1409_vm9, -1.0, %v1039_v34 }
 0x130   :  { %v70_v41 = vadd.f32 1e-05, %v66_v40 }
 0x132   :  { %1288 = vrsqrt.f32 %v70_v41 }
 0x134   :  { %v1283_v42 = vpop.eup %1282 }
 0x135   :  { %v75_v43 = vmul.f32 %v1283_v42, %v43_v12  ;;  %v330_v12 = vshll.u32 %v1306_v11, %v327_v4 }
 0x137   :  { %v86_v48 = vmul.f32 %v1174_v44, %v75_v43  ;;  %v1042_v43 = vsel %vm1032_vm10, -1.0, %v1040_v39 }
 0x138   :  { %v1285_v45 = vpop.eup %1284 }
 0x139   :  { %v1287_v46 = vpop.eup %1286  ;;  %v76_v47 = vmul.f32 %v1285_v45, %v44_v20  ;;  %v97_v54 = vadd.f32 %v1175_v50, %v86_v48  ;;  %v1309_v20 = vmov 2102212464   ;;  %v1253_v45 = vpack.c.bf16 %v1042_v43, %v1041_v38 }
 0x13a   :  { %v77_v49 = vmul.f32 %v1287_v46, %v45_v13  ;;  %v1307_v13 = vmov 2475754826   ;;  %v337_v31 = vshrl.u32 %v1309_v20, %v1383_v6  ;;  %v321_v46 = vor.u32 8388608, %v320_v36 }
 0x13b   :  { %v87_v51 = vmul.f32 %v1174_v44, %v76_v47  ;;  %v333_v14 = vshll.u32 %v1307_v13, %v327_v4  ;;  %v331_v29 = vshrl.u32 %v1307_v13, %v1383_v6  ;;  %v358_v47 = vsel %vm348_vm11, %v344_v37, 1326507024  ;;  %1254 = vmatprep.subr.bf16.mxu1 %v1253_v45 }
 0x13c   :  { %v1289_v52 = vpop.eup %1288  ;;  %v88_v56 = vmul.f32 %v1174_v44, %v77_v49  ;;  %v338_v42 = vor.u32 %v337_v31, %v336_v16  ;;  %1256 = vmatpush3.bf16.msra.mxu1 %v1253_v45 }
 0x13d   :  { %v78_v53 = vmul.f32 %v1289_v52, %v46_v21  ;;  %v98_v55 = vadd.f32 %v1175_v50, %v87_v51  ;;  %v339_v21 = vshll.u32 %v1309_v20, %v327_v4  ;;  %v332_v40 = vor.u32 %v331_v29, %v330_v12 }
 0x13e   :  { %v99_v59 = vadd.f32 %v1175_v50, %v88_v56  ;;  %v335_v41 = vor.u32 %v334_v30, %v333_v14  ;;  %v361_v52 = vshll.u32 %v321_v46, 8 }
 0x13f   :  { %v101_v57 = vpack.c.bf16 %v98_v55, %v97_v54  ;;  %v89_v58 = vmul.f32 %v1174_v44, %v78_v53  ;;  %v341_v35 = vor.u32 %v340_v23, %v339_v21 }
 0x140   :  { %v353_v48 = vsel %vm345_vm13, %v332_v40, %v335_v41 }
 0x141   :  { %1239 = vmatprep.mubr.msk.bf16.mxu0 %vm25_vm0, %v101_v57  ;;  %v100_v60 = vadd.f32 %v1175_v50, %v89_v58  ;;  %v354_v44 = vsel %vm348_vm11, %v341_v35, 920167782  ;;  %v357_v50 = vsel %vm345_vm13, %v335_v41, %v338_v42  ;;  %v359_v51 = vsel %vm347_vm14, %v341_v35, %v358_v47 }
 0x142   :  { %v355_v49 = vsel %vm347_vm14, %v338_v42, %v354_v44  ;;  %v360_v54 = vsel %vm346_vm15, %v357_v50, %v359_v51  ;;  %v329_v57 = vshrl.u32 %v1306_v11, %v1383_v6 }
 0x143   :  { %v102_v61 = vpack.c.bf16 %v100_v60, %v99_v59  ;;  %v356_v53 = vsel %vm346_vm15, %v353_v48, %v355_v49  ;;  %v1445_v58 = vmul.u32.u64.low %v361_v52, %v360_v54  ;;  %v1446_v59 = vmul.u32.u64.high %v361_v52, %v360_v54, %v1445_v58 }
 0x144   :  { %v1440_v55 = vmul.u32.u64.low %v361_v52, %v356_v53  ;;  %v1441_v56 = vmul.u32.u64.high %v361_v52, %v356_v53, %v1440_v55  ;;  %v350_v60 = vsel %vm348_vm11, %v338_v42, 2102212464  ;;  %v1507_v58 = vld [vmem:[%s1847_s3 + $0x8] sm:$0xff] }
 0x145   :  { %1240 = vmatmul.mubr.msk.bf16.vlgmr.msra.gmra.mrb[0].mxu0 %vm25_vm0, %v102_v61  ;;  %v349_v61 = vsel %vm345_vm13, %v329_v57, %v332_v40  ;;  %v351_v63 = vsel %vm347_vm14, %v335_v41, %v350_v60  ;;  %v213_v60 = vand.u32 2139095040, %v1507_v58 }
 0x146   :  { %v352_v0 = vsel %vm346_vm15, %v349_v61, %v351_v63  ;;  %v371_v1 = vadd.s32 1, %v1441_v56  ;;  %vm370_vm0 = vc.u32 %v1446_v59, %v1440_v55  ;;  %v369_v19 = vadd.s32 %v1440_v55, %v1446_v59 }
 0x147   :  { %v368_v2 = vmul.u32 %v361_v52, %v352_v0  ;;  %v1496_v52 = vld [vmem:[%s1847_s3] sm:$0xff]  ;;  %v214_v0 = vshrl.u32 %v213_v60, 23 }
 0x148   :  { %v372_v3 = vsel %vm370_vm0, %v371_v1, %v1441_v56  ;;  %v110_v53 = vand.u32 2139095040, %v1496_v52  ;;  %v1502_v56 = vld [vmem:[%s1847_s3 + $0x18] sm:$0xff] }
 0x149   :  { %v373_v4 = vadd.s32 %v372_v3, %v368_v2  ;;  %v419_v59 = vand.u32 2139095040, %v1502_v56  ;;  %v1180_v3 = vadd.s32 4294967169, %v214_v0 }
 0x14a   :  { %v111_v54 = vshrl.u32 %v110_v53, 23 }
 0x14b   :  { %v374_v5 = vadd.s32 536870912, %v373_v4  ;;  %v420_v61 = vshrl.u32 %v419_v59, 23 }
 0x14c   :  { %v1176_v55 = vadd.s32 4294967169, %v111_v54 }
 0x14d   :  { %v375_v6 = vshrl.u32 %v374_v5, 30  ;;  %v1188_v1 = vadd.s32 4294967169, %v420_v61 }
 0x14e   :  { %v117_v57 = vadd.s32 1, %v1176_v55 }
 0x14f   :  { %v376_v7 = vshll.u32 %v375_v6, 30  ;;  %v399_v36 = vsub.s32 4, %v375_v6 }
 0x150   :  { %vm118_vm9 = vcmp.gt.s32.totalorder %v117_v57, 0 }
 0x151   :  { %v377_v8 = vsub.s32 %v373_v4, %v376_v7  ;;  %v400_v37 = vsel %vm315_vm2, %v399_v36, %v375_v6  ;;  %v119_v63 = vsel %vm118_vm9, %v117_v57, 0  ;;  %v426_v4 = vadd.s32 1, %v1188_v1 }
 0x152   :  { %v1464_v38 = vsel %vm314_vm3, 0, %v400_v37  ;;  %v121_v2 = vand.u32 31, %v119_v63  ;;  %v220_v6 = vadd.s32 1, %v1180_v3  ;;  %v107_v7 = vand.u32 2147483647, %v1496_v52 }
 0x153   :  { %v379_v12 = vsub.s32 0, %v377_v8  ;;  %v406_v41 = vand.u32 3, %v1464_v38  ;;  %vm427_vm10 = vcmp.gt.s32.totalorder %v426_v4, 0  ;;  %v416_v37 = vand.u32 2147483647, %v1502_v56 }
 0x154   :  { %v122_v5 = vsub.s32 32, %v121_v2  ;;  %vm221_vm11 = vcmp.gt.s32.totalorder %v220_v6, 0 }
 0x155   :  { %v1185_v14 = vmin.u32 %v379_v12, %v377_v8  ;;  %vm408_vm4 = vcmp.eq.s32.totalorder %v406_v41, 0  ;;  %vm411_vm5 = vcmp.eq.s32.totalorder %v406_v41, 2  ;;  %vm407_vm6 = vcmp.lt.s32.totalorder %v406_v41, 2 }
 0x156   :  { %v134_v12 = vshrl.u32 %v1310_v22, %v122_v5  ;;  %v1558_v54 = vand.u32 8388607, %v416_v37  ;;  %v1564_v59 = vshrl.u32 %v1306_v11, %v122_v5 }
 0x157   :  { %v381_v16 = vclz %v1185_v14  ;;  %v1514_v14 = vshrl.u32 %v119_v63, 5 }
 0x159   :  { %v1186_v17 = vadd.s32 4294967294, %v381_v16  ;;  %v124_v16 = vshll.u32 %v1306_v11, %v121_v2  ;;  %vm142_vm12 = vcmp.lt.s32.totalorder %v1514_v14, 4  ;;  %vm139_vm13 = vcmp.lt.s32.totalorder %v1514_v14, 1 }
 0x15a   :  { %vm141_vm14 = vcmp.lt.s32.totalorder %v1514_v14, 3  ;;  %vm140_vm15 = vcmp.lt.s32.totalorder %v1514_v14, 2 }
 0x15b   :  { %vm1187_vm1 = vcmp.lt.s32.totalorder %v1186_v17, 0 }
 0x15c   :  { %v384_v18 = vsel %vm1187_vm1, 0, %v1186_v17  ;;  %v125_v17 = vshrl.u32 %v1307_v13, %v122_v5 }
 0x15d   :  { %v389_v10 = vsub.s32 4294967266, %v384_v18  ;;  %v385_v21 = vsub.s32 32, %v384_v18  ;;  %v386_v24 = vshll.u32 %v377_v8, %v384_v18  ;;  %v133_v8 = vshll.u32 %v1309_v20, %v121_v2 }
 0x15e   :  { %v428_v18 = vsel %vm427_vm10, %v426_v4, 0  ;;  %v210_v4 = vand.u32 2147483647, %v1507_v58 }
 0x15f   :  { %v390_v23 = vadd.s32 127, %v389_v10  ;;  %v387_v25 = vshrl.u32 %v369_v19, %v385_v21  ;;  %v127_v10 = vshll.u32 %v1307_v13, %v121_v2  ;;  %v128_v19 = vshrl.u32 %v1308_v15, %v122_v5 }
 0x160   :  { %v130_v21 = vshll.u32 %v1308_v15, %v121_v2  ;;  %v1560_v55 = vshrl.u32 %v428_v18, 5 }
 0x161   :  { %v391_v27 = vshll.u32 %v390_v23, 23  ;;  %v388_v28 = vor.u32 %v387_v25, %v386_v24  ;;  %v131_v23 = vshrl.u32 %v1309_v20, %v122_v5  ;;  %v114_v24 = vand.u32 8388607, %v107_v7 }
 0x162   :  { %v135_v25 = vor.u32 %v134_v12, %v133_v8  ;;  %vm451_vm1 = vcmp.lt.s32.totalorder %v1560_v55, 4 }
 0x163   :  { %v392_v29 = vor.u32 4788187, %v391_v27  ;;  %v395_v31 = vcvt.s32.f32 %v388_v28  ;;  %v222_v27 = vsel %vm221_vm11, %v220_v6, 0  ;;  %v136_v28 = vshll.u32 %v1310_v22, %v121_v2 }
 0x164   :  { %v148_v36 = vsel %vm142_vm12, %v135_v25, 920167782 }
 0x165   :  { %v393_v30 = vand.u32 2147483647, %v392_v29  ;;  %v137_v29 = vshrl.u32 %v1311_v26, %v122_v5  ;;  %v1581_v5 = vshrl.u32 %v222_v27, 5 }
 0x167   :  { %v396_v32 = vmul.f32 %v395_v31, %v393_v30  ;;  %v430_v30 = vand.u32 31, %v428_v18  ;;  %v1527_v31 = vor.u32 %v125_v17, %v124_v16  ;;  %v138_v41 = vor.u32 %v137_v29, %v136_v28 }
 0x168   :  { %v217_v29 = vand.u32 8388607, %v210_v4  ;;  %vm245_vm0 = vcmp.lt.s32.totalorder %v1581_v5, 4 }
 0x169   :  { %v397_v33 = vxor.u32 2147483648, %v396_v32  ;;  %v433_v57 = vshll.u32 %v1306_v11, %v430_v30  ;;  %v152_v61 = vsel %vm142_vm12, %v138_v41, 1326507024  ;;  %v442_v0 = vshll.u32 %v1309_v20, %v430_v30 }
 0x16a   :  { %v445_v12 = vshll.u32 %v1310_v22, %v430_v30  ;;  %v436_v28 = vshll.u32 %v1307_v13, %v430_v30 }
 0x16b   :  { %v398_v34 = vsel %vm315_vm2, %v397_v33, %v396_v32  ;;  %v1529_v32 = vor.u32 %v128_v19, %v127_v10  ;;  %v1531_v33 = vor.u32 %v131_v23, %v130_v21  ;;  %vm242_vm2 = vcmp.lt.s32.totalorder %v1581_v5, 1 }
 0x16c   :  { %v401_v35 = vsel %vm314_vm3, %v1380_v62, %v398_v34  ;;  %v224_v34 = vand.u32 31, %v222_v27  ;;  %vm244_vm3 = vcmp.lt.s32.totalorder %v1581_v5, 3 }
 0x16d   :  { %1290 = vcosq.f32 %v401_v35  ;;  %v151_v53 = vsel %vm139_vm13, %v1529_v32, %v1531_v33 }
 0x16e   :  { %1292 = vsinq.f32 %v401_v35  ;;  %v115_v35 = vor.u32 8388608, %v114_v24  ;;  %v236_v2 = vshll.u32 %v1309_v20, %v224_v34  ;;  %v239_v6 = vshll.u32 %v1310_v22, %v224_v34 }
 0x16f   :  { %v227_v17 = vshll.u32 %v1306_v11, %v224_v34  ;;  %v230_v10 = vshll.u32 %v1307_v13, %v224_v34  ;;  %v233_v21 = vshll.u32 %v1308_v15, %v224_v34 }
 0x177   :  { %v1466_v39 = vpop.eup %1290 }
 0x178   :  { %v1468_v40 = vpop.eup %1292  ;;  %v412_v43 = vxor.u32 2147483648, %v1466_v39 }
 0x179   :  { %v409_v42 = vxor.u32 2147483648, %v1468_v40 }
 0x17a   :  { %v413_v44 = vsel %vm411_vm5, %v412_v43, %v1468_v40  ;;  %vm450_vm5 = vcmp.lt.s32.totalorder %v1560_v55, 3 }
 0x17b   :  { %v410_v9 = vsel %vm408_vm4, %v1466_v39, %v409_v42  ;;  %vm448_vm4 = vcmp.lt.s32.totalorder %v1560_v55, 1 }
 0x17c   :  { %v414_v45 = vsel %vm407_vm6, %v410_v9, %v413_v44  ;;  %v1538_v9 = vsub.s32 32, %v430_v30  ;;  %v147_v44 = vsel %vm139_vm13, %v1527_v31, %v1529_v32  ;;  %vm243_vm6 = vcmp.lt.s32.totalorder %v1581_v5, 2 }
 0x17d   :  { %v415_v46 = vsel %vm1849_vm7, nan, %v414_v45  ;;  %v149_v45 = vsel %vm141_vm14, %v1531_v33, %v148_v36 }
 0x17e   :  { %v1568_v60 = vsel %vm140_vm15, %v147_v44, %v149_v45  ;;  %v434_v63 = vshrl.u32 %v1307_v13, %v1538_v9  ;;  %v443_v1 = vshrl.u32 %v1310_v22, %v1538_v9  ;;  %v446_v16 = vshrl.u32 %v1311_v26, %v1538_v9 }
 0x17f   :  { %v440_v36 = vshrl.u32 %v1309_v20, %v1538_v9 }
 0x180   :  { %v444_v41 = vor.u32 %v443_v1, %v442_v0  ;;  %v447_v44 = vor.u32 %v446_v16, %v445_v12  ;;  %v144_v16 = vsel %vm142_vm12, %v1531_v33, 2102212464 }
 0x218   :  { %v1241_v47 = vpop.f32.mrb[0].mxu0 }
 0x219   :  { %v1482_v48 = vmul.f32 %v1241_v47, %v415_v46  ;;  %v1484_v49 = vpop.f32.mrb[1].mxu0  ;;  %v1548_v46 = vsub.s32 32, %v224_v34  ;;  %v437_v34 = vshrl.u32 %v1308_v15, %v1538_v9 }
 0x21a   :  { %v1486_v50 = vpop.f32.mrb[2].mxu0  ;;  %1247 = vmatprep.mubr.msk.f32.mxu1 %vm1043_vm8, %v1484_v49 }
 0x21b   :  { %v1489_v51 = vpop.f32.mrb[3].mxu0  ;;  %v237_v3 = vshrl.u32 %v1310_v22, %v1548_v46  ;;  %v240_v8 = vshrl.u32 %v1311_v26, %v1548_v46  ;;  %v228_v18 = vshrl.u32 %v1307_v13, %v1548_v46  ;;  %v231_v19 = vshrl.u32 %v1308_v15, %v1548_v46 }
 0x21c   :  { %1248 = vmatmul.mubr.msk.f32.vlgmr.msra.gmra.mrb[0].mxu1 %vm1043_vm8, %v1489_v51  ;;  %v234_v23 = vshrl.u32 %v1309_v20, %v1548_v46  ;;  %v153_v22 = vsel %vm141_vm14, %v135_v25, %v152_v61  ;;  %v439_v25 = vshll.u32 %v1308_v15, %v430_v30  ;;  %v435_v30 = vor.u32 %v434_v63, %v433_v57 }
 0x21d   :  { %1250 = vmatprep.mubr.msk.f32.mxu1 %vm1043_vm8, %v1241_v47  ;;  %v1550_v47 = vshll.u32 %v115_v35, 8  ;;  %v238_v27 = vor.u32 %v237_v3, %v236_v2  ;;  %v241_v35 = vor.u32 %v240_v8, %v239_v6  ;;  %v229_v45 = vor.u32 %v228_v18, %v227_v17 }
 0x21e   :  { %v235_v61 = vor.u32 %v234_v23, %v233_v21  ;;  %v154_v15 = vsel %vm140_vm15, %v151_v53, %v153_v22  ;;  %v218_v2 = vor.u32 8388608, %v217_v29  ;;  %v438_v0 = vor.u32 %v437_v34, %v436_v28 }
 0x21f   :  { %v1602_v26 = vmul.u32.u64.low %v1550_v47, %v1568_v60  ;;  %v1603_v24 = vmul.u32.u64.high %v1550_v47, %v1568_v60, %v1602_v26  ;;  %v232_v60 = vor.u32 %v231_v19, %v230_v10  ;;  %v251_v13 = vsel %vm245_vm0, %v238_v27, 920167782 }
 0x220   :  { %1251 = vmatmul.mubr.msk.f32.gmra.mrb[2].mxu1 %vm1043_vm8, %v1486_v50  ;;  %v255_v20 = vsel %vm245_vm0, %v241_v35, 1326507024  ;;  %v441_v1 = vor.u32 %v440_v36, %v439_v25  ;;  %v457_v3 = vsel %vm451_vm1, %v444_v41, 920167782  ;;  %v252_v53 = vsel %vm244_vm3, %v235_v61, %v251_v13 }
 0x221   :  { %v250_v6 = vsel %vm242_vm2, %v229_v45, %v232_v60  ;;  %v424_v57 = vor.u32 8388608, %v1558_v54  ;;  %v461_v63 = vsel %vm451_vm1, %v447_v44, 1326507024  ;;  %v254_v8 = vsel %vm242_vm2, %v232_v60, %v235_v61 }
 0x222   :  { %v256_v12 = vsel %vm244_vm3, %v238_v27, %v255_v20  ;;  %v1644_v17 = vmul.u32.u64.low %v1550_v47, %v154_v15  ;;  %v1645_v18 = vmul.u32.u64.high %v1550_v47, %v154_v15, %v1644_v17  ;;  %v258_v10 = vshll.u32 %v218_v2, 8 }
 0x223   :  { %vm449_vm8 = vcmp.lt.s32.totalorder %v1560_v55, 2  ;;  %v456_v54 = vsel %vm448_vm4, %v435_v30, %v438_v0  ;;  %v458_v19 = vsel %vm450_vm5, %v441_v1, %v457_v3  ;;  %v253_v21 = vsel %vm243_vm6, %v250_v6, %v252_v53 }
 0x224   :  { %v460_v23 = vsel %vm448_vm4, %v438_v0, %v441_v1  ;;  %v462_v33 = vsel %vm450_vm5, %v444_v41, %v461_v63  ;;  %v257_v22 = vsel %vm243_vm6, %v254_v8, %v256_v12  ;;  %v143_v27 = vsel %vm139_vm13, %v1564_v59, %v1527_v31 }
 0x225   :  { %v464_v28 = vshll.u32 %v424_v57, 8  ;;  %v145_v29 = vsel %vm141_vm14, %v1529_v32, %v144_v16  ;;  %v459_v35 = vsel %vm449_vm8, %v456_v54, %v458_v19  ;;  %v463_v36 = vsel %vm449_vm8, %v460_v23, %v462_v33 }
 0x226   :  { %v1669_v34 = vmul.u32.u64.low %v258_v10, %v253_v21  ;;  %v1670_v25 = vmul.u32.u64.high %v258_v10, %v253_v21, %v1669_v34  ;;  %v226_v41 = vshrl.u32 %v1306_v11, %v1548_v46  ;;  %v247_v59 = vsel %vm245_vm0, %v235_v61, 2102212464 }
 0x227   :  { %v1677_v44 = vmul.u32.u64.low %v258_v10, %v257_v22  ;;  %v1678_v31 = vmul.u32.u64.high %v258_v10, %v257_v22, %v1677_v44  ;;  %v146_v32 = vsel %vm140_vm15, %v143_v27, %v145_v29  ;;  %v165_v13 = vadd.s32 1, %v1603_v24 }
 0x228   :  { %v1685_v15 = vmul.u32.u64.low %v464_v28, %v459_v35  ;;  %v1686_v2 = vmul.u32.u64.high %v464_v28, %v459_v35, %v1685_v15  ;;  %vm164_vm9 = vc.u32 %v1645_v18, %v1602_v26  ;;  %v432_v46 = vshrl.u32 %v1306_v11, %v1538_v9 }
 0x229   :  { %v1693_v20 = vmul.u32.u64.low %v464_v28, %v463_v36  ;;  %v1694_v3 = vmul.u32.u64.high %v464_v28, %v463_v36, %v1693_v20  ;;  %v453_v61 = vsel %vm451_vm1, %v441_v1, 2102212464  ;;  %v246_v14 = vsel %vm242_vm2, %v226_v41, %v229_v45 }
 0x22a   :  { %v248_v6 = vsel %vm244_vm3, %v232_v60, %v247_v59  ;;  %v162_v53 = vmul.u32 %v1550_v47, %v146_v32  ;;  %v166_v57 = vsel %vm164_vm9, %v165_v13, %v1603_v24  ;;  %v452_v63 = vsel %vm448_vm4, %v432_v46, %v435_v30 }
 0x22b   :  { %v454_v11 = vsel %vm450_vm5, %v438_v0, %v453_v61  ;;  %v249_v9 = vsel %vm243_vm6, %v246_v14, %v248_v6  ;;  %v268_v1 = vadd.s32 1, %v1670_v25  ;;  %vm267_vm10 = vc.u32 %v1678_v31, %v1669_v34 }
 0x22c   :  { %v167_v45 = vadd.s32 %v166_v57, %v162_v53  ;;  %v455_v47 = vsel %vm449_vm8, %v452_v63, %v454_v11  ;;  %v474_v24 = vadd.s32 1, %v1686_v2  ;;  %v265_v60 = vmul.u32 %v258_v10, %v249_v9 }
 0x22d   :  { %vm473_vm11 = vc.u32 %v1694_v3, %v1685_v15  ;;  %v269_v30 = vsel %vm267_vm10, %v268_v1, %v1670_v25  ;;  %v471_v0 = vmul.u32 %v464_v28, %v455_v47  ;;  %v163_v53 = vadd.s32 %v1602_v26, %v1645_v18 }
 0x22e   :  { %v168_v5 = vadd.s32 536870912, %v167_v45  ;;  %v475_v8 = vsel %vm473_vm11, %v474_v24, %v1686_v2  ;;  %v270_v12 = vadd.s32 %v269_v30, %v265_v60  ;;  %v266_v60 = vadd.s32 %v1669_v34, %v1678_v31 }
 0x22f   :  { %v476_v16 = vadd.s32 %v475_v8, %v471_v0  ;;  %v472_v8 = vadd.s32 %v1685_v15, %v1694_v3  ;;  %vm109_vm15 = vcmp.lt.s32.totalorder %v1496_v52, 0  ;;  %vm1738_vm0 = vcmp.le.f32.partialorder %v107_v7, 0.7853982 }
 0x230   :  { %v1720_v17 = vshrl.u32 %v168_v5, 30  ;;  %v271_v54 = vadd.s32 536870912, %v270_v12  ;;  %vm212_vm1 = vcmp.lt.s32.totalorder %v1507_v58, 0  ;;  %vm418_vm2 = vcmp.lt.s32.totalorder %v1502_v56, 0 }
 0x231   :  { %v477_v19 = vadd.s32 536870912, %v476_v16  ;;  %vm1751_vm3 = vcmp.le.f32.partialorder %v210_v4, 0.7853982  ;;  %vm1760_vm4 = vcmp.le.f32.partialorder %v416_v37, 0.7853982  ;;  %vm302_vm11 = vweird.f32 %v1507_v58 }
 0x232   :  { %v170_v55 = vshll.u32 %v1720_v17, 30  ;;  %v1723_v21 = vshrl.u32 %v271_v54, 30 }
 0x233   :  { %v1725_v10 = vshrl.u32 %v477_v19, 30 }
 0x234   :  { %v171_v23 = vsub.s32 %v167_v45, %v170_v55  ;;  %v273_v33 = vshll.u32 %v1723_v21, 30 }
 0x235   :  { %v479_v22 = vshll.u32 %v1725_v10, 30 }
 0x236   :  { %v173_v27 = vsub.s32 0, %v171_v23  ;;  %v274_v28 = vsub.s32 %v270_v12, %v273_v33 }
 0x237   :  { %v480_v29 = vsub.s32 %v476_v16, %v479_v22 }
 0x238   :  { %v1177_v35 = vmin.u32 %v173_v27, %v171_v23  ;;  %v276_v25 = vsub.s32 0, %v274_v28 }
 0x239   :  { %v482_v36 = vsub.s32 0, %v480_v29 }
 0x23a   :  { %v175_v41 = vclz %v1177_v35  ;;  %v1181_v44 = vmin.u32 %v276_v25, %v274_v28 }
 0x23b   :  { %v1189_v59 = vmin.u32 %v482_v36, %v480_v29 }
 0x23c   :  { %v1178_v32 = vadd.s32 4294967294, %v175_v41  ;;  %v278_v13 = vclz %v1181_v44 }
 0x23d   :  { %v484_v2 = vclz %v1189_v59 }
 0x23e   :  { %vm1179_vm12 = vcmp.lt.s32.totalorder %v1178_v32, 0  ;;  %v1182_v46 = vadd.s32 4294967294, %v278_v13 }
 0x23f   :  { %v178_v20 = vsel %vm1179_vm12, 0, %v1178_v32  ;;  %v1190_v61 = vadd.s32 4294967294, %v484_v2 }
 0x240   :  { %vm1183_vm13 = vcmp.lt.s32.totalorder %v1182_v46, 0  ;;  %v183_v14 = vsub.s32 4294967266, %v178_v20  ;;  %v179_v57 = vsub.s32 32, %v178_v20  ;;  %v180_v1 = vshll.u32 %v171_v23, %v178_v20 }
 0x241   :  { %vm1191_vm14 = vcmp.lt.s32.totalorder %v1190_v61, 0  ;;  %v281_v6 = vsel %vm1183_vm13, 0, %v1182_v46 }
 0x242   :  { %v184_v63 = vadd.s32 127, %v183_v14  ;;  %v487_v11 = vsel %vm1191_vm14, 0, %v1190_v61  ;;  %v286_v9 = vsub.s32 4294967266, %v281_v6  ;;  %v181_v45 = vshrl.u32 %v163_v53, %v179_v57 }
 0x243   :  { %v492_v47 = vsub.s32 4294967266, %v487_v11  ;;  %v282_v30 = vsub.s32 32, %v281_v6  ;;  %v488_v12 = vsub.s32 32, %v487_v11  ;;  %v283_v18 = vshll.u32 %v274_v28, %v281_v6 }
 0x244   :  { %v185_v24 = vshll.u32 %v184_v63, 23  ;;  %v287_v0 = vadd.s32 127, %v286_v9  ;;  %v182_v5 = vor.u32 %v181_v45, %v180_v1  ;;  %v489_v55 = vshll.u32 %v480_v29, %v487_v11 }
 0x245   :  { %v493_v16 = vadd.s32 127, %v492_v47  ;;  %v284_v54 = vshrl.u32 %v266_v60, %v282_v30  ;;  %v490_v23 = vshrl.u32 %v472_v8, %v488_v12  ;;  %v193_v14 = vsub.s32 4, %v1720_v17 }
 0x246   :  { %v186_v26 = vor.u32 4788187, %v185_v24  ;;  %v288_v19 = vshll.u32 %v287_v0, 23  ;;  %v189_v27 = vcvt.s32.f32 %v182_v5  ;;  %v502_v57 = vsub.s32 4, %v1725_v10 }
 0x247   :  { %v494_v33 = vshll.u32 %v493_v16, 23  ;;  %v285_v35 = vor.u32 %v284_v54, %v283_v18  ;;  %v491_v34 = vor.u32 %v490_v23, %v489_v55  ;;  %v296_v63 = vsub.s32 4, %v1723_v21 }
 0x248   :  { %v187_v22 = vand.u32 2147483647, %v186_v26  ;;  %v289_v25 = vor.u32 4788187, %v288_v19  ;;  %v194_v11 = vsel %vm109_vm15, %v193_v14, %v1720_v17  ;;  %v503_v1 = vsel %vm418_vm2, %v502_v57, %v1725_v10 }
 0x249   :  { %v495_v31 = vor.u32 4788187, %v494_v33  ;;  %v292_v44 = vcvt.s32.f32 %v285_v35  ;;  %v498_v15 = vcvt.s32.f32 %v491_v34  ;;  %v196_v9 = vsel %vm1738_vm0, 0, %v194_v11 }
 0x24a   :  { %v190_v36 = vmul.f32 %v189_v27, %v187_v22  ;;  %v290_v41 = vand.u32 2147483647, %v289_v25  ;;  %v297_v45 = vsel %vm212_vm1, %v296_v63, %v1723_v21  ;;  %v200_v47 = vand.u32 3, %v196_v9 }
 0x24b   :  { %v496_v59 = vand.u32 2147483647, %v495_v31  ;;  %v505_v24 = vsel %vm1760_vm4, 0, %v503_v1  ;;  %v299_v60 = vsel %vm1751_vm3, 0, %v297_v45  ;;  %v612_v5 = vadd.s32 3, %v196_v9 }
 0x24c   :  { %v191_v3 = vxor.u32 2147483648, %v190_v36  ;;  %v293_v32 = vmul.f32 %v292_v44, %v290_v41  ;;  %v716_v0 = vadd.s32 3, %v299_v60  ;;  %v1789_v12 = vand.u32 3, %v505_v24 }
 0x24d   :  { %v499_v28 = vmul.f32 %v498_v15, %v496_v59  ;;  %vm205_vm5 = vcmp.eq.s32.totalorder %v200_v47, 2  ;;  %v303_v26 = vand.u32 3, %v299_v60  ;;  %vm202_vm6 = vcmp.eq.s32.totalorder %v200_v47, 0 }
 0x24e   :  { %v192_v13 = vsel %vm109_vm15, %v191_v3, %v190_v36  ;;  %v294_v2 = vxor.u32 2147483648, %v293_v32  ;;  %v717_v18 = vand.u32 3, %v716_v0  ;;  %v924_v54 = vadd.s32 3, %v505_v24 }
 0x24f   :  { %v195_v46 = vsel %vm1738_vm0, %v1496_v52, %v192_v13  ;;  %v500_v20 = vxor.u32 2147483648, %v499_v28  ;;  %v613_v19 = vand.u32 3, %v612_v5  ;;  %v820_v55 = vadd.s32 3, %v1464_v38 }
 0x250   :  { %v295_v61 = vsel %vm212_vm1, %v294_v2, %v293_v32  ;;  %1294 = vcosq.f32 %v195_v46  ;;  %vm201_vm8 = vcmp.lt.s32.totalorder %v200_v47, 2  ;;  %vm511_vm9 = vcmp.eq.s32.totalorder %v1789_v12, 0 }
 0x251   :  { %1296 = vsinq.f32 %v195_v46  ;;  %v501_v53 = vsel %vm418_vm2, %v500_v20, %v499_v28  ;;  %v298_v4 = vsel %vm1751_vm3, %v1507_v58, %v295_v61  ;;  %vm514_vm12 = vcmp.eq.s32.totalorder %v1789_v12, 2 }
 0x252   :  { %v504_v37 = vsel %vm1760_vm4, %v1502_v56, %v501_v53  ;;  %1298 = vcosq.f32 %v298_v4  ;;  %vm308_vm13 = vcmp.eq.s32.totalorder %v303_v26, 2  ;;  %vm305_vm14 = vcmp.eq.s32.totalorder %v303_v26, 0 }
 0x253   :  { %1300 = vsinq.f32 %v298_v4  ;;  %vm719_vm15 = vcmp.eq.s32.totalorder %v717_v18, 0  ;;  %vm722_vm0 = vcmp.eq.s32.totalorder %v717_v18, 2  ;;  %v925_v38 = vand.u32 3, %v924_v54 }
 0x254   :  { %1302 = vcosq.f32 %v504_v37  ;;  %vm615_vm2 = vcmp.eq.s32.totalorder %v613_v19, 0  ;;  %vm618_vm3 = vcmp.eq.s32.totalorder %v613_v19, 2  ;;  %v821_v34 = vand.u32 3, %v820_v55 }
 0x255   :  { %1304 = vsinq.f32 %v504_v37  ;;  %vm718_vm4 = vcmp.lt.s32.totalorder %v717_v18, 2  ;;  %vm930_vm7 = vcmp.eq.s32.totalorder %v925_v38, 2 }
 0x256   :  { %vm823_vm10 = vcmp.eq.s32.totalorder %v821_v34, 0  ;;  %vm826_vm1 = vcmp.eq.s32.totalorder %v821_v34, 2 }
 0x257   :  { %v825_v14 = vsel %vm823_vm10, %v1466_v39, %v409_v42  ;;  %v828_v6 = vsel %vm826_vm1, %v412_v43, %v1468_v40 }
 0x25a   :  { %v1295_v17 = vpop.eup %1294 }
 0x25b   :  { %v1297_v30 = vpop.eup %1296  ;;  %v206_v8 = vxor.u32 2147483648, %v1295_v17 }
 0x25c   :  { %v1299_v10 = vpop.eup %1298  ;;  %v203_v16 = vxor.u32 2147483648, %v1297_v30 }
 0x25d   :  { %v1301_v21 = vpop.eup %1300  ;;  %v207_v33 = vsel %vm205_vm5, %v206_v8, %v1297_v30  ;;  %v309_v22 = vxor.u32 2147483648, %v1299_v10  ;;  %vm614_vm5 = vcmp.lt.s32.totalorder %v613_v19, 2  ;;  %v620_v32 = vsel %vm618_vm3, %v206_v8, %v1297_v30 }
 0x25e   :  { %v1303_v23 = vpop.eup %1302  ;;  %v204_v35 = vsel %vm202_vm6, %v1295_v17, %v203_v16  ;;  %v306_v25 = vxor.u32 2147483648, %v1301_v21  ;;  %v617_v3 = vsel %vm615_vm2, %v1295_v17, %v203_v16  ;;  %vm927_vm6 = vcmp.eq.s32.totalorder %v925_v38, 0 }
 0x25f   :  { %v1305_v27 = vpop.eup %1304  ;;  %v515_v36 = vxor.u32 2147483648, %v1303_v23  ;;  %v310_v41 = vsel %vm308_vm13, %v309_v22, %v1301_v21  ;;  %v724_v15 = vsel %vm722_vm0, %v309_v22, %v1301_v21  ;;  %v208_v28 = vsel %vm201_vm8, %v204_v35, %v207_v33 }
 0x260   :  { %v512_v31 = vxor.u32 2147483648, %v1305_v27  ;;  %v307_v44 = vsel %vm305_vm14, %v1299_v10, %v306_v25  ;;  %v721_v59 = vsel %vm719_vm15, %v1299_v10, %v306_v25  ;;  %vm1860_vm13 = vcmp.lt.s32.totalorder %v303_v26, 2 }
 0x261   :  { %v516_v13 = vsel %vm514_vm12, %v515_v36, %v1305_v27  ;;  %v311_v2 = vsel %vm1860_vm13, %v307_v44, %v310_v41  ;;  %v725_v46 = vsel %vm718_vm4, %v721_v59, %v724_v15  ;;  %v621_v20 = vsel %vm614_vm5, %v617_v3, %v620_v32 }
 0x262   :  { %v513_v29 = vsel %vm511_vm9, %v1303_v23, %v512_v31  ;;  %vm926_vm14 = vcmp.lt.s32.totalorder %v925_v38, 2  ;;  %v929_v7 = vsel %vm927_vm6, %v1303_v23, %v512_v31  ;;  %v932_v61 = vsel %vm930_vm7, %v515_v36, %v1305_v27 }
 0x263   :  { %vm822_vm15 = vcmp.lt.s32.totalorder %v821_v34, 2  ;;  %vm508_vm8 = vweird.f32 %v1502_v56  ;;  %v312_v53 = vsel %vm302_vm11, nan, %v311_v2  ;;  %v726_v4 = vsel %vm302_vm11, nan, %v725_v46 }
 0x264   :  { %vm1861_vm9 = vweird.f32 %v1496_v52  ;;  %vm1862_vm7 = vcmp.lt.s32.totalorder %v1789_v12, 2  ;;  %v933_v11 = vsel %vm926_vm14, %v929_v7, %v932_v61  ;;  %v829_v40 = vsel %vm822_vm15, %v825_v14, %v828_v6 }
 0x265   :  { %v209_v57 = vsel %vm1861_vm9, nan, %v208_v28  ;;  %v517_v63 = vsel %vm1862_vm7, %v513_v29, %v516_v13  ;;  %vm1863_vm10 = vmmov %vm1861_vm9  ;;  %v1007_v43 = vmul.f32 %v1489_v51, %v312_v53  ;;  %v934_v45 = vsel %vm508_vm8, nan, %v933_v11 }
 0x266   :  { %v622_v42 = vsel %vm1863_vm10, nan, %v621_v20  ;;  %v1006_v9 = vmul.f32 %v1484_v49, %v209_v57  ;;  %v518_v58 = vsel %vm508_vm8, nan, %v517_v63  ;;  %vm1864_vm11 = vweird.f32 %v1380_v62 }
 0x267   :  { %v830_v47 = vsel %vm1864_vm11, nan, %v829_v40  ;;  %vm1165_vm12 = vcmask 125952   ;;  %v1009_v60 = vmul.f32 %v1486_v50, %v518_v58 }
 0x2ef   :  { %v1249_v39 = vpop.f32.mrb[0].mxu1 }
 0x2f0   :  { %v1142_v56 = vmul.f32 %v1249_v39, %v726_v4  ;;  %v1122_v37 = vpop.f32.mrb[1].mxu1 }
 0x2f1   :  { %v1141_v1 = vmul.f32 %v1122_v37, %v622_v42 }
 0x2f2   :  { %v1146_v17 = vadd.f32 %v1142_v56, %v1007_v43 }
 0x2f3   :  { %v1145_v24 = vadd.f32 %v1141_v1, %v1006_v9  ;;  %v1252_v52 = vpop.f32.mrb[2].mxu1 }
 0x2f4   :  { %v1222_v30 = vpack.c.bf16 %v1146_v17, %v1146_v17  ;;  %v1144_v0 = vmul.f32 %v1252_v52, %v934_v45  ;;  %v1132_v5 = vpop.f32.mrb[3].mxu1 }
 0x2f5   :  { %v1221_v51 = vpack.c.bf16 %v1145_v24, %v1145_v24  ;;  %v1143_v8 = vmul.f32 %v1132_v5, %v830_v47 }
 0x2f6   :  { %1167 = vst.msk [vmem:[%s1848_s5 + $0x4] sm:$0xf] %vm1165_vm12, %v1222_v30  ;;  %v1148_v49 = vadd.f32 %v1144_v0, %v1009_v60 }
 0x2f7   :  { %1166 = vst.msk [vmem:[%s1848_s5] sm:$0xf] %vm1165_vm12, %v1221_v51  ;;  %v1147_v62 = vadd.f32 %v1143_v8, %v1482_v48 }
 0x2f8   :  { %v1224_v12 = vpack.c.bf16 %v1148_v49, %v1148_v49 }
 0x2f9   :  { %v1223_v50 = vpack.c.bf16 %v1147_v62, %v1147_v62 }
 0x2fa   :  { %1169 = vst.msk [vmem:[%s1848_s5 + $0xc] sm:$0xf] %vm1165_vm12, %v1224_v12 }
 0x2fb   :  { %1168 = vst.msk [vmem:[%s1848_s5 + $0x8] sm:$0xf] %vm1165_vm12, %v1223_v50 }

</bundles_post_ra>
